<compile_context>
chip_gen: v6e
topology: v6e:2x2x1
jax: 0.10.0
libtpu: 0.0.40
codegen_flags: <defaults>
</compile_context>

<pallas_src>
import jax
import jax.numpy as jnp
from jax.experimental import pallas as pl
from jax.experimental.pallas import tpu as pltpu


def _round_up(x, m):
    return ((x + m - 1) // m) * m


def _cdiv(a, b):
    return -(-a // b)


def _patch_embed_kernel(x_ref, w_ref, b_ref, o_ref):
    # x_ref: (tm, K)   compute dtype (bf16/f32)
    # w_ref: (K, td)   compute dtype (resident / single-buffered when td == D)
    # b_ref: (1, td)   f32
    # o_ref: (tm, td)  output dtype
    acc = jnp.dot(x_ref[...], w_ref[...], preferred_element_type=jnp.float32)
    o_ref[...] = (acc + b_ref[...]).astype(o_ref.dtype)


def _resident_spec(shape, index_map):
    """BlockSpec for a grid-resident operand: single-buffer it to save VMEM."""
    try:
        return pl.BlockSpec(shape, index_map, pipeline_mode=pl.Buffered(1))
    except (AttributeError, TypeError):
        # Older JAX without pipeline_mode / Buffered: fall back to default.
        return pl.BlockSpec(shape, index_map)


def img_tokenizer_forward(x, weight, bias, patch_size, flatten=True, *,
                          tm=1024, compute_dtype=jnp.bfloat16, out_dtype=None):
    """ViT patch embedding (== img_tokenizer.forward).

    x:      (B, C, H, W)             (PyTorch NCHW layout)
    weight: (embed_dim, C, ph, pw)   (PyTorch Conv2d weight)
    bias:   (embed_dim,)
    Returns (tokens, Gh, Gw).
    """
    B, C, H, W = x.shape
    ph, pw = patch_size
    Gh, Gw = H // ph, W // pw
    D = weight.shape[0]
    K = C * ph * pw
    M = B * Gh * Gw
    out_dtype = out_dtype or x.dtype
    compute_dtype = compute_dtype or x.dtype

    # --- glue: extract non-overlapping patches -> (M, K) --------------------
    # Cast first so the rearrange moves narrower data; allow_input_fusion on
    # operand 0 lets XLA fold this into the pallas_call operand read.
    xc = x.astype(compute_dtype)
    patches = xc.reshape(B, C, Gh, ph, Gw, pw)
    patches = patches.transpose(0, 2, 4, 1, 3, 5).reshape(M, K)

    # Conv weight flattened to (K, D): row order (C, ph, pw) matches the patch
    # flatten order above (== PyTorch weight.reshape(D, -1)).
    w_mat = weight.astype(compute_dtype).reshape(D, K).T
    b_mat = bias.astype(jnp.float32).reshape(1, D)

    csize = jnp.dtype(compute_dtype).itemsize
    osize = jnp.dtype(out_dtype).itemsize

    # --- VMEM budget ---------------------------------------------------------
    try:
        vmem_cap = int(pltpu.get_tpu_info().vmem_capacity_bytes)
    except Exception:
        vmem_cap = 64 * 1024 * 1024          # v7x-safe fallback
    budget = int(vmem_cap * 0.7)

    # --- D tile --------------------------------------------------------------
    td = D
    if D % 256 == 0 and D >= 512:
        if M <= tm:
            # Single M step: split D so both v7x TensorCores get work
            # (patches block index is then constant -> no extra HBM reads).
            td = D // 2
        # Keep the resident weight slice well inside the budget.
        while K * td * csize > budget // 2 and td % 256 == 0 and td > 256:
            td //= 2
    grid_d = D // td
    w_bufs = 1 if grid_d == 1 else 2         # single-buffer only when resident

    # --- M tile --------------------------------------------------------------
    def _vmem_need(tm_):
        return (2 * tm_ * K * csize          # patches tile (double-buffered)
                + 2 * tm_ * td * osize       # output tile (double-buffered)
                + w_bufs * K * td * csize    # weight slice
                + w_bufs * td * 4)           # bias slice

    if M <= tm:
        tm_eff = _round_up(M, 8)             # single block covers all rows
    else:
        tm_eff = max(256, (tm // 256) * 256)
    while tm_eff > 256 and _vmem_need(tm_eff) > budget:
        tm_eff -= 256
    grid_m = _cdiv(M, tm_eff)

    vmem_limit = int(min(vmem_cap,
                         max(_vmem_need(tm_eff) * 1.25 + (4 << 20), 32 << 20)))

    # --- specs ---------------------------------------------------------------
    x_spec = pl.BlockSpec((tm_eff, K), lambda i, j: (i, 0))
    o_spec = pl.BlockSpec((tm_eff, td), lambda i, j: (i, j))
    if grid_d == 1:
        w_spec = _resident_spec((K, td), lambda i, j: (0, j))
        b_spec = _resident_spec((1, td), lambda i, j: (0, j))
    else:
        w_spec = pl.BlockSpec((K, td), lambda i, j: (0, j))
        b_spec = pl.BlockSpec((1, td), lambda i, j: (0, j))

    cost = pl.CostEstimate(
        flops=2 * M * K * D,
        transcendentals=0,
        bytes_accessed=(M * K * csize + K * D * csize + M * D * osize + D * 4),
    )

    out = pl.pallas_call(
        _patch_embed_kernel,
        out_shape=jax.ShapeDtypeStruct((M, D), out_dtype),
        grid_spec=pltpu.PrefetchScalarGridSpec(
            num_scalar_prefetch=0,
            grid=(grid_m, grid_d),
            in_specs=[x_spec, w_spec, b_spec],
            out_specs=o_spec,
        ),
        compiler_params=pltpu.CompilerParams(
            dimension_semantics=("parallel", "parallel"),
            allow_input_fusion=[True, False, False],
            vmem_limit_bytes=vmem_limit,
        ),
        cost_estimate=cost,
    )(patches, w_mat, b_mat)

    if flatten:
        tokens = out.reshape(B, Gh * Gw, D)       # == flatten(2).transpose(1,2)
    else:
        # un-flattened conv output layout: (B, embed_dim, Gh, Gw)
        tokens = out.reshape(B, Gh, Gw, D).transpose(0, 3, 1, 2)
    # norm = nn.Identity()  (norm_layer=None)
    return tokens, Gh, Gw


if __name__ == "__main__":
    # Small shapes consistent with the module: img 16x16, patch 4, 4 chans, dim 32.
    B, C, H, W = 2, 4, 16, 16
    patch = (4, 4)
    embed_dim = 32

    key = jax.random.PRNGKey(0)
    kx, kw, kb = jax.random.split(key, 3)
    x = jax.random.normal(kx, (B, C, H, W), dtype=jnp.float32)

    # Deterministic Conv2d-style init (uniform in +-1/sqrt(fan_in)).
    fan_in = C * patch[0] * patch[1]
    bound = 1.0 / (fan_in ** 0.5)
    weight = jax.random.uniform(kw, (embed_dim, C, patch[0], patch[1]),
                                minval=-bound, maxval=bound, dtype=jnp.float32)
    bias = jax.random.uniform(kb, (embed_dim,), minval=-bound, maxval=bound,
                              dtype=jnp.float32)

    # Reference: plain-JAX strided conv (== patch matmul) in f32.
    Hg, Wg = H // patch[0], W // patch[1]
    ref = jax.lax.conv_general_dilated(
        x, weight, window_strides=patch, padding="VALID",
        dimension_numbers=("NCHW", "OIHW", "NCHW"))
    ref = ref + bias.reshape(1, embed_dim, 1, 1)
    ref = ref.reshape(B, embed_dim, Hg * Wg).transpose(0, 2, 1)

    # Default path: bf16 compute on every generation, f32 accumulate + f32 out.
    tokens, gh, gw = img_tokenizer_forward(x, weight, bias, patch)
    tokens = jax.block_until_ready(tokens)
    assert tokens.shape == (B, Hg * Wg, embed_dim)
    assert (gh, gw) == (Hg, Wg)
    assert jnp.allclose(tokens, ref, atol=5e-2, rtol=5e-2)

    # Exact f32 compute path.
    tokens_f32, _, _ = img_tokenizer_forward(
        x, weight, bias, patch, compute_dtype=jnp.float32)
    tokens_f32 = jax.block_until_ready(tokens_f32)
    assert jnp.allclose(tokens_f32, ref, atol=1e-5, rtol=1e-5)

    # bf16 output path (halves the output HBM stream; result rounded at store).
    tokens_bf16, _, _ = img_tokenizer_forward(
        x, weight, bias, patch, out_dtype=jnp.bfloat16)
    tokens_bf16 = jax.block_until_ready(tokens_bf16)
    assert jnp.allclose(tokens_bf16.astype(jnp.float32), ref, atol=8e-2, rtol=8e-2)

    print("KERNEL_OK")
</pallas_src>

<mosaic_0001>
module attributes {stable_mosaic.version = 11 : i64} {
  func.func @_patch_embed_kernel(%arg0: i32, %arg1: i32, %arg2: memref<32x64xbf16, #tpu.memory_space<vmem>>, %arg3: memref<64x32xbf16, #tpu.memory_space<vmem>>, %arg4: memref<1x32xf32, #tpu.memory_space<vmem>>, %arg5: memref<32x32xf32, #tpu.memory_space<vmem>>) attributes {dimension_semantics = [#tpu.dimension_semantics<parallel>, #tpu.dimension_semantics<parallel>], iteration_bounds = array<i64: 1, 1>, scalar_prefetch = 0 : i64, scratch_operands = 0 : i64, tpu.core_type = #tpu.core_type<tc>, window_params = [{transform_indices = @transform_0, window_bounds = array<i64: 32, 64>}, {pipeline_mode = #tpu.pipeline_mode<synchronous>, transform_indices = @transform_1, window_bounds = array<i64: 64, 32>}, {pipeline_mode = #tpu.pipeline_mode<synchronous>, transform_indices = @transform_2, window_bounds = array<i64: 1, 32>}, {transform_indices = @transform_3, window_bounds = array<i64: 32, 32>}]} {
    %c0 = arith.constant 0 : index
    %c0_0 = arith.constant 0 : index
    %0 = vector.load %arg2[%c0, %c0_0] : memref<32x64xbf16, #tpu.memory_space<vmem>>, vector<32x64xbf16>
    %c0_1 = arith.constant 0 : index
    %c0_2 = arith.constant 0 : index
    %1 = vector.load %arg3[%c0_1, %c0_2] : memref<64x32xbf16, #tpu.memory_space<vmem>>, vector<64x32xbf16>
    %cst = arith.constant dense<0.000000e+00> : vector<32x32xf32>
    %2 = tpu.matmul %0, %1, %cst {dimension_numbers = #tpu.dot_dimension_numbers<[1], [0], [0], [1], [0, 0, 1, 1], [], []>} : vector<32x64xbf16>, vector<64x32xbf16>, vector<32x32xf32> -> vector<32x32xf32>
    %c0_3 = arith.constant 0 : index
    %c0_4 = arith.constant 0 : index
    %3 = vector.load %arg4[%c0_3, %c0_4] : memref<1x32xf32, #tpu.memory_space<vmem>>, vector<1x32xf32>
    %4 = vector.broadcast %3 : vector<1x32xf32> to vector<32x32xf32>
    %5 = arith.addf %2, %4 : vector<32x32xf32>
    %c0_5 = arith.constant 0 : index
    %c0_6 = arith.constant 0 : index
    %6 = vector.load %arg5[%c0_5, %c0_6] : memref<32x32xf32, #tpu.memory_space<vmem>>, vector<32x32xf32>
    tpu.vector_store %arg5[%c0_5, %c0_6], %5 {strides = array<i32>} : memref<32x32xf32, #tpu.memory_space<vmem>>, vector<32x32xf32>,
    return
  }
  func.func @transform_0(%arg0: i32, %arg1: i32) -> (i32, i32) {
    %c0_i32 = arith.constant 0 : i32
    %c0_i32_0 = arith.constant 0 : i32
    return %arg0, %c0_i32 : i32, i32
  }
  func.func @transform_1(%arg0: i32, %arg1: i32) -> (i32, i32) {
    %c0_i32 = arith.constant 0 : i32
    %c0_i32_0 = arith.constant 0 : i32
    return %c0_i32, %arg1 : i32, i32
  }
  func.func @transform_2(%arg0: i32, %arg1: i32) -> (i32, i32) {
    %c0_i32 = arith.constant 0 : i32
    %c0_i32_0 = arith.constant 0 : i32
    return %c0_i32, %arg1 : i32, i32
  }
  func.func @transform_3(%arg0: i32, %arg1: i32) -> (i32, i32) {
    %c0_i32 = arith.constant 0 : i32
    return %arg0, %arg1 : i32, i32
  }
}

</mosaic_0001>

<bundles_post_ra>
// kernel: tpu_custom_call.1
= control target key start
LH: loop header
LB: loop body
LE: loop exit
PB: predicated region body
PF: predicated region fallthrough
CT: control target
= control target key end

     0   :  { %vm69_vm0 = vcmask 523264   ;;  %s251_s0 = inlined_call_operand.vmem [shape: bf16[32,64], index: 0, kind: input, shape index: {}]   ;;  %s252_s1 = inlined_call_operand.vmem [shape: bf16[64,32], index: 1, kind: input, shape index: {}]   ;;  %s253_s2 = inlined_call_operand.vmem [shape: f32[1,32], index: 2, kind: input, shape index: {}]   ;;  %s254_s3 = inlined_call_operand.hbm [shape: f32[32,32], index: 3, kind: output, shape index: {}]  }
   0x1   :  { %v176_v0 = vld [vmem:[%s252_s1 + $0x18] sm:$0xff]   ;;  %v177_v1 = vld [vmem:[%s252_s1 + $0x10] sm:$0xff]   ;;  %v178_v2 = vld [vmem:[%s252_s1 + $0x8] sm:$0xff]  }
   0x2   :  { %161 = vmatprep.subr.bf16.mxu0 %v176_v0  ;;  %v180_v3 = vld [vmem:[%s251_s0] sm:$0xff]  }
   0x3   :  { %162 = vmatpush3.bf16.msra.mxu0 %v176_v0  ;;  %169 = vmatprep.mubr.msk.bf16.mxu0 %vm69_vm0, %v180_v3 }
   0x4   :  { %163 = vmatprep.subr.bf16.mxu0 %v177_v1 }
   0x5   :  { %8 = vsyncpa [#allocation3], 0  ;;  %v179_v4 = vld [vmem:[%s252_s1] sm:$0xff]   ;;  %v181_v5 = vld [vmem:[%s251_s0 + $0x8] sm:$0xff]   ;;  %vm125_vm1 = vcmask 261120   ;;  %s204_s26 = smov [#allocation2]  }
   0x6   :  { %v146_v6 = vld [vmem:[%s253_s2] ss:$0 sm:$0xff]  ;;  %s135_s1 = sshll.u32 %s204_s26, 4  ;;  %s136_s1 = int_to_ptr.vmem [resolvable:$true] %s135_s1 }
   0x7   :  { %164 = vmatpush3.bf16.msra.mxu0 %v177_v1  ;;  %s182_s0 = scalar_lea.vmem %s136_s1, 512  ;;  %p187_p1 = scmp.lt.s32.totalorder %s136_s1, %s136_s1 }
   0x8   :  { %165 = vmatprep.subr.bf16.mxu0 %v178_v2  ;;  %p183_p0 = scmp.ne.s32.totalorder %s136_s1, %s182_s0  ;;  %p188_p2 = scmp.lt.s32.totalorder %s182_s0, %s182_s0 }
   0xa   :  { %p189_p3 = por %p188_p2, %p187_p1 }
   0xb   :  { %166 = vmatpush3.bf16.msra.mxu0 %v178_v2 }
   0xc   :  { %167 = vmatprep.subr.bf16.mxu0 %v179_v4  ;;  %p190_p4 = pnand %p189_p3, %p183_p0 }
   0xf   :  { %168 = vmatpush3.bf16.msra.mxu0 %v179_v4 }
  0x12   :  { %170 = vmatmul.mubr.msk.bf16.vlgmr.msra.gmra.mxu0 %vm69_vm0, %v181_v5 }
  0xd2   :  { %v171_v7 = vpop.f32.mrf.mxu0 }
  0xd3   :  { %v119_v8 = vadd.f32 %v171_v7, %v146_v6 }
  0xd4   :  { %v110_v9 = vpop.f32.mrf.mxu0 }
  0xd5   :  { %128 = vst.msk [vmem:[#allocation2 + $0x10] sm:$0xff] %vm125_vm1, %v119_v8  ;;  %v111_v10 = vadd.f32 %v146_v6, %v110_v9 }
  0xd6   :  { %v172_v11 = vpop.f32.mrf.mxu0 }
  0xd7   :  { %126 = vst.msk [vmem:[#allocation2] sm:$0xff] %vm125_vm1, %v111_v10  ;;  %v122_v12 = vadd.f32 %v172_v11, %v146_v6 }
  0xd8   :  { %v113_v13 = vpop.f32.mrf.mxu0 }
  0xd9   :  { %129 = vst.msk [vmem:[#allocation2 + $0x18] sm:$0xff] %vm125_vm1, %v122_v12  ;;  %v114_v14 = vadd.f32 %v146_v6, %v113_v13 }
  0xdb   :  { %127 = vst.msk [vmem:[#allocation2 + $0x8] sm:$0xff] %vm125_vm1, %v114_v14 }
  0xdc   :  { %193 = shalt.err (!%p190_p4)
}
  0xdd   :  { %s205_s2 = smov 128   ;;  %s206_s27 = smov 8  }
  0xde   :  { %141 = dma.vmem_to_hbm [thread:$0]  %s136_s1, 512, %s254_s3, [#allocation3], %s205_s2, %s205_s2, %s206_s27  }
  0xdf   :  { %202 = dma.done.wait [#allocation3], 512  }
  0xe0   :  { %203 = vsyncadd [#allocation3], 4294966784 }
  0xe1   :  { %145 = vsyncpa [#allocation3], 1 }

</bundles_post_ra>
